<compile_context>
chip_gen: v7x
topology: tpu7x:2x2x1
jax: 0.10.0
libtpu: 0.0.40
codegen_flags: <defaults>
</compile_context>

<pallas_src>
import functools

import jax
import jax.numpy as jnp
from jax.experimental import pallas as pl
from jax.experimental.pallas import tpu as pltpu

# `service` in the original script is data-dependent (max of column 2 of the
# KDD-99 dataset, typically ~66 distinct services). Use a small fixed value.
SERVICE = 64
H1, H2 = 20, 10
_LAYER_DIMS = ((SERVICE, H1), (H1, H2), (H2, H1), (H1, SERVICE))


def _round_up(x, m):
    return ((x + m - 1) // m) * m


def _sae_kernel(x_ref, w_ref, b_ref, o_ref):
    """Full 4-layer MLP forward on one batch tile, all resident in VMEM.

    w_ref: [4, F, F]  zero-padded (in, out) weights, one slab per layer.
    b_ref: [4, 1, F]  zero-padded biases.
    Padded hidden columns become sigmoid(0)=0.5 but always multiply all-zero
    rows of the next weight slab, so they contribute exactly 0 to valid outputs.
    """
    h = x_ref[...].astype(jnp.float32)                              # [TB, F]

    h = jnp.dot(h, w_ref[0], preferred_element_type=jnp.float32)
    h = jax.nn.sigmoid(h + b_ref[0])

    h = jnp.dot(h, w_ref[1], preferred_element_type=jnp.float32)
    h = jax.nn.sigmoid(h + b_ref[1])

    h = jnp.dot(h, w_ref[2], preferred_element_type=jnp.float32)
    h = jax.nn.sigmoid(h + b_ref[2])

    h = jnp.dot(h, w_ref[3], preferred_element_type=jnp.float32)
    o_ref[...] = (h + b_ref[3]).astype(o_ref.dtype)                 # no final activation


def _pack_params(params):
    """Pack the 4 (w, b) pairs into one [4,F,F] weight slab + one [4,1,F] bias slab."""
    f = SERVICE
    w_slab = jnp.zeros((4, f, f), jnp.float32)
    b_slab = jnp.zeros((4, 1, f), jnp.float32)
    for l, (din, dout) in enumerate(_LAYER_DIMS):
        w = params[f"w{l + 1}"].astype(jnp.float32)            # [din, dout] (pre-transposed)
        b = params[f"b{l + 1}"].reshape(1, -1).astype(jnp.float32)
        w_slab = w_slab.at[l, :din, :dout].set(w)
        b_slab = b_slab.at[l, :, :dout].set(b)
    return w_slab, b_slab


@functools.partial(jax.jit, static_argnames=("batch_tile",))
def sae_forward(x, params, *, batch_tile=1024):
    """x: [B, SERVICE] (f32 or bf16). params: dict w1..w4 ([in,out]), b1..b4 ([1,out]).

    batch_tile: rows per grid step. Large tiles (512-2048; 4096+ on v7x) keep this
    HBM-bound kernel near roofline; it is clamped to the (8-rounded) batch so
    small inputs do not pay for padding.
    """
    B, F = x.shape
    assert F == SERVICE, f"expected feature dim {SERVICE}, got {F}"

    w_slab, b_slab = _pack_params(params)

    # Effective tile: at most batch_tile, at most the sublane-rounded batch.
    tile = min(batch_tile, _round_up(B, 8))
    b_pad = _round_up(B, tile)
    if b_pad != B:
        x = jnp.pad(x, ((0, b_pad - B), (0, 0)))

    grid = (b_pad // tile,)

    cost = pl.CostEstimate(
        flops=2 * B * (F * H1 + H1 * H2 + H2 * H1 + H1 * F),
        transcendentals=B * (H1 + H2 + H1),
        bytes_accessed=2 * B * F * x.dtype.itemsize + w_slab.nbytes + b_slab.nbytes,
    )

    out = pl.pallas_call(
        _sae_kernel,
        out_shape=jax.ShapeDtypeStruct((b_pad, F), x.dtype),
        grid_spec=pltpu.PrefetchScalarGridSpec(
            num_scalar_prefetch=0,
            grid=grid,
            in_specs=[
                pl.BlockSpec((tile, F), lambda i: (i, 0)),       # activations (tiled on batch)
                pl.BlockSpec((4, F, F), lambda i: (0, 0, 0)),    # packed weights (resident)
                pl.BlockSpec((4, 1, F), lambda i: (0, 0, 0)),    # packed biases (resident)
            ],
            out_specs=pl.BlockSpec((tile, F), lambda i: (i, 0)),
        ),
        compiler_params=pltpu.CompilerParams(
            dimension_semantics=("parallel",)),  # batch axis shards across TCs on v7x
        cost_estimate=cost,
    )(x, w_slab, b_slab)

    return out[:B] if b_pad != B else out


def init_params(key):
    """Deterministic init mimicking nn.Linear's U(-1/sqrt(fan_in), 1/sqrt(fan_in))."""
    params = {}
    keys = jax.random.split(key, 2 * len(_LAYER_DIMS))
    for idx, (fan_in, fan_out) in enumerate(_LAYER_DIMS):
        bound = 1.0 / jnp.sqrt(fan_in)
        # stored already transposed: [in, out]
        w = jax.random.uniform(keys[2 * idx], (fan_in, fan_out),
                               jnp.float32, -bound, bound)
        b = jax.random.uniform(keys[2 * idx + 1], (1, fan_out),
                               jnp.float32, -bound, bound)
        params[f"w{idx + 1}"] = w
        params[f"b{idx + 1}"] = b
    return params


def sae_forward_ref(x, params):
    """Plain-JAX reference for correctness check."""
    h = jax.nn.sigmoid(x @ params["w1"] + params["b1"])
    h = jax.nn.sigmoid(h @ params["w2"] + params["b2"])
    h = jax.nn.sigmoid(h @ params["w3"] + params["b3"])
    return h @ params["w4"] + params["b4"]


if __name__ == "__main__":
    key = jax.random.PRNGKey(0)
    kp, kx = jax.random.split(key)

    params = init_params(kp)

    # Small but non-trivial: batch that neither divides the tile nor is a
    # multiple of 8, to exercise wrapper-side padding and a multi-step grid.
    x = jax.random.normal(kx, (100, SERVICE), jnp.float32)
    ref = sae_forward_ref(x, params)

    # Multi-step grid path (100 -> padded 128, grid of 4 tiles of 32).
    out = jax.block_until_ready(sae_forward(x, params, batch_tile=32))
    assert out.shape == (100, SERVICE)
    assert jnp.allclose(out, ref, atol=1e-5, rtol=1e-5), "mismatch vs JAX reference"

    # Default large-tile path (tile clamped to the batch, single grid step).
    out2 = jax.block_until_ready(sae_forward(x, params))
    assert out2.shape == (100, SERVICE)
    assert jnp.allclose(out2, ref, atol=1e-5, rtol=1e-5), "mismatch vs JAX reference"

    print("KERNEL_OK")
</pallas_src>

<mosaic_0001>
module attributes {stable_mosaic.version = 11 : i64} {
  func.func @_sae_kernel(%arg0: i32, %arg1: memref<32x64xf32, #tpu.memory_space<vmem>>, %arg2: memref<4x64x64xf32, #tpu.memory_space<vmem>>, %arg3: memref<4x1x64xf32, #tpu.memory_space<vmem>>, %arg4: memref<32x64xf32, #tpu.memory_space<vmem>>) attributes {dimension_semantics = [#tpu.dimension_semantics<parallel>], iteration_bounds = array<i64: 4>, scalar_prefetch = 0 : i64, scratch_operands = 0 : i64, tpu.core_type = #tpu.core_type<tc>, window_params = [{transform_indices = @transform_0, window_bounds = array<i64: 32, 64>}, {pipeline_mode = #tpu.pipeline_mode<synchronous>, transform_indices = @transform_1, window_bounds = array<i64: 4, 64, 64>}, {pipeline_mode = #tpu.pipeline_mode<synchronous>, transform_indices = @transform_2, window_bounds = array<i64: 4, 1, 64>}, {transform_indices = @transform_3, window_bounds = array<i64: 32, 64>}]} {
    %c0 = arith.constant 0 : index
    %c0_0 = arith.constant 0 : index
    %0 = vector.load %arg1[%c0, %c0_0] : memref<32x64xf32, #tpu.memory_space<vmem>>, vector<32x64xf32>
    %c0_1 = arith.constant 0 : index
    %c0_2 = arith.constant 0 : index
    %c0_3 = arith.constant 0 : index
    %1 = vector.load %arg2[%c0_1, %c0_2, %c0_3] : memref<4x64x64xf32, #tpu.memory_space<vmem>>, vector<1x64x64xf32>
    %2 = vector.shape_cast %1 : vector<1x64x64xf32> to vector<64x64xf32>
    %cst = arith.constant dense<0.000000e+00> : vector<32x64xf32>
    %3 = tpu.matmul %0, %2, %cst {dimension_numbers = #tpu.dot_dimension_numbers<[1], [0], [0], [1], [0, 0, 1, 1], [], []>} : vector<32x64xf32>, vector<64x64xf32>, vector<32x64xf32> -> vector<32x64xf32>
    %c0_4 = arith.constant 0 : index
    %c0_5 = arith.constant 0 : index
    %c0_6 = arith.constant 0 : index
    %4 = vector.load %arg3[%c0_4, %c0_5, %c0_6] : memref<4x1x64xf32, #tpu.memory_space<vmem>>, vector<1x1x64xf32>
    %5 = vector.shape_cast %4 : vector<1x1x64xf32> to vector<1x64xf32>
    %6 = vector.broadcast %5 : vector<1x64xf32> to vector<32x64xf32>
    %7 = arith.addf %3, %6 : vector<32x64xf32>
    %8 = arith.negf %7 : vector<32x64xf32>
    %9 = math.exp %8 : vector<32x64xf32>
    %cst_7 = arith.constant 1.000000e+00 : f32
    %10 = vector.broadcast %cst_7 : f32 to vector<32x64xf32>
    %11 = arith.addf %10, %9 : vector<32x64xf32>
    %12 = arith.divf %10, %11 : vector<32x64xf32>
    %c1 = arith.constant 1 : index
    %c0_8 = arith.constant 0 : index
    %c0_9 = arith.constant 0 : index
    %13 = vector.load %arg2[%c1, %c0_8, %c0_9] : memref<4x64x64xf32, #tpu.memory_space<vmem>>, vector<1x64x64xf32>
    %14 = vector.shape_cast %13 : vector<1x64x64xf32> to vector<64x64xf32>
    %cst_10 = arith.constant dense<0.000000e+00> : vector<32x64xf32>
    %15 = tpu.matmul %12, %14, %cst_10 {dimension_numbers = #tpu.dot_dimension_numbers<[1], [0], [0], [1], [0, 0, 1, 1], [], []>} : vector<32x64xf32>, vector<64x64xf32>, vector<32x64xf32> -> vector<32x64xf32>
    %c1_11 = arith.constant 1 : index
    %c0_12 = arith.constant 0 : index
    %c0_13 = arith.constant 0 : index
    %16 = vector.load %arg3[%c1_11, %c0_12, %c0_13] : memref<4x1x64xf32, #tpu.memory_space<vmem>>, vector<1x1x64xf32>
    %17 = vector.shape_cast %16 : vector<1x1x64xf32> to vector<1x64xf32>
    %18 = vector.broadcast %17 : vector<1x64xf32> to vector<32x64xf32>
    %19 = arith.addf %15, %18 : vector<32x64xf32>
    %20 = arith.negf %19 : vector<32x64xf32>
    %21 = math.exp %20 : vector<32x64xf32>
    %cst_14 = arith.constant 1.000000e+00 : f32
    %22 = vector.broadcast %cst_14 : f32 to vector<32x64xf32>
    %23 = arith.addf %22, %21 : vector<32x64xf32>
    %24 = arith.divf %22, %23 : vector<32x64xf32>
    %c2 = arith.constant 2 : index
    %c0_15 = arith.constant 0 : index
    %c0_16 = arith.constant 0 : index
    %25 = vector.load %arg2[%c2, %c0_15, %c0_16] : memref<4x64x64xf32, #tpu.memory_space<vmem>>, vector<1x64x64xf32>
    %26 = vector.shape_cast %25 : vector<1x64x64xf32> to vector<64x64xf32>
    %cst_17 = arith.constant dense<0.000000e+00> : vector<32x64xf32>
    %27 = tpu.matmul %24, %26, %cst_17 {dimension_numbers = #tpu.dot_dimension_numbers<[1], [0], [0], [1], [0, 0, 1, 1], [], []>} : vector<32x64xf32>, vector<64x64xf32>, vector<32x64xf32> -> vector<32x64xf32>
    %c2_18 = arith.constant 2 : index
    %c0_19 = arith.constant 0 : index
    %c0_20 = arith.constant 0 : index
    %28 = vector.load %arg3[%c2_18, %c0_19, %c0_20] : memref<4x1x64xf32, #tpu.memory_space<vmem>>, vector<1x1x64xf32>
    %29 = vector.shape_cast %28 : vector<1x1x64xf32> to vector<1x64xf32>
    %30 = vector.broadcast %29 : vector<1x64xf32> to vector<32x64xf32>
    %31 = arith.addf %27, %30 : vector<32x64xf32>
    %32 = arith.negf %31 : vector<32x64xf32>
    %33 = math.exp %32 : vector<32x64xf32>
    %cst_21 = arith.constant 1.000000e+00 : f32
    %34 = vector.broadcast %cst_21 : f32 to vector<32x64xf32>
    %35 = arith.addf %34, %33 : vector<32x64xf32>
    %36 = arith.divf %34, %35 : vector<32x64xf32>
    %c3 = arith.constant 3 : index
    %c0_22 = arith.constant 0 : index
    %c0_23 = arith.constant 0 : index
    %37 = vector.load %arg2[%c3, %c0_22, %c0_23] : memref<4x64x64xf32, #tpu.memory_space<vmem>>, vector<1x64x64xf32>
    %38 = vector.shape_cast %37 : vector<1x64x64xf32> to vector<64x64xf32>
    %cst_24 = arith.constant dense<0.000000e+00> : vector<32x64xf32>
    %39 = tpu.matmul %36, %38, %cst_24 {dimension_numbers = #tpu.dot_dimension_numbers<[1], [0], [0], [1], [0, 0, 1, 1], [], []>} : vector<32x64xf32>, vector<64x64xf32>, vector<32x64xf32> -> vector<32x64xf32>
    %c3_25 = arith.constant 3 : index
    %c0_26 = arith.constant 0 : index
    %c0_27 = arith.constant 0 : index
    %40 = vector.load %arg3[%c3_25, %c0_26, %c0_27] : memref<4x1x64xf32, #tpu.memory_space<vmem>>, vector<1x1x64xf32>
    %41 = vector.shape_cast %40 : vector<1x1x64xf32> to vector<1x64xf32>
    %42 = vector.broadcast %41 : vector<1x64xf32> to vector<32x64xf32>
    %43 = arith.addf %39, %42 : vector<32x64xf32>
    %c0_28 = arith.constant 0 : index
    %c0_29 = arith.constant 0 : index
    %44 = vector.load %arg4[%c0_28, %c0_29] : memref<32x64xf32, #tpu.memory_space<vmem>>, vector<32x64xf32>
    tpu.vector_store %arg4[%c0_28, %c0_29], %43 {strides = array<i32>} : memref<32x64xf32, #tpu.memory_space<vmem>>, vector<32x64xf32>,
    return
  }
  func.func @transform_0(%arg0: i32) -> (i32, i32) {
    %c0_i32 = arith.constant 0 : i32
    %c0_i32_0 = arith.constant 0 : i32
    return %arg0, %c0_i32 : i32, i32
  }
  func.func @transform_1(%arg0: i32) -> (i32, i32, i32) {
    %c0_i32 = arith.constant 0 : i32
    %c0_i32_0 = arith.constant 0 : i32
    %c0_i32_1 = arith.constant 0 : i32
    %c0_i32_2 = arith.constant 0 : i32
    return %c0_i32, %c0_i32_0, %c0_i32_1 : i32, i32, i32
  }
  func.func @transform_2(%arg0: i32) -> (i32, i32, i32) {
    %c0_i32 = arith.constant 0 : i32
    %c0_i32_0 = arith.constant 0 : i32
    %c0_i32_1 = arith.constant 0 : i32
    %c0_i32_2 = arith.constant 0 : i32
    return %c0_i32, %c0_i32_0, %c0_i32_1 : i32, i32, i32
  }
  func.func @transform_3(%arg0: i32) -> (i32, i32) {
    %c0_i32 = arith.constant 0 : i32
    %c0_i32_0 = arith.constant 0 : i32
    return %arg0, %c0_i32 : i32, i32
  }
}

</mosaic_0001>

<bundles_post_ra>
// kernel: sae_forward.1
= control target key start
LH: loop header
LB: loop body
LE: loop exit
PB: predicated region body
PF: predicated region fallthrough
CT: control target
= control target key end

     0   :  { %s1119_s12 = smov 0   ;;  %s1271_s0 = inlined_call_operand.vmem [shape: f32[128,64], index: 0, kind: input, shape index: {}]   ;;  %s1272_s1 = inlined_call_operand.vmem [shape: f32[4,64,64], index: 1, kind: input, shape index: {}]   ;;  %s1273_s2 = inlined_call_operand.vmem [shape: f32[4,1,64], index: 2, kind: input, shape index: {}]   ;;  %s1274_s3 = inlined_call_operand.vmem [shape: f32[128,64], index: 3, kind: output, shape index: {}]  }
   0x1 LB: > { %s765_s13 = sadd.s32 4294967295, %s1097_s12   ;;  %p769_p0 = scmp.ge.s32.totalorder %s1097_s12, 1  ;;  %s1097_s12 = sphi %s1119_s12, %s13_s12  }
   0x2   : > { %p138_p1 = scmp.lt.s32.totalorder %s1097_s12, 5 }
   0x4   : > { %p139_p2 = pnand %p769_p0, %p138_p1 }
   0x5   : > { %v178_v0 = vld [vmem:[%s1272_s1] sm:$0xff] (!%p139_p2)  ;;  %v179_v1 = vld [vmem:[%s1272_s1 + $0x8] sm:$0xff] (!%p139_p2)  ;;  %v180_v2 = vld [vmem:[%s1272_s1 + $0x10] sm:$0xff] (!%p139_p2)  ;;  %s770_s20 = sshll.u32 (!%p139_p2), %s765_s13, 2  ;;  %vm193_vm0 = vcmask (!%p139_p2), 523264  }
   0x6   : > { %142 = sbr.rel (%p139_p2) target bundleno = 970 (0x3ca), region = 32  ;;  %v971_v3 = vpack.c.bf16 (!%p139_p2), %v179_v1, %v178_v0  ;;  %v181_v4 = vld [vmem:[%s1272_s1 + $0x18] sm:$0xff] (!%p139_p2)  ;;  %p163_p3 = scmp.lt.s32.totalorder (!%p139_p2), %s770_s20, 15  ;;  %v182_v6 = vld [vmem:[%s1272_s1 + $0x20] sm:$0xff] (!%p139_p2)  ;;  %v183_v7 = vld [vmem:[%s1272_s1 + $0x28] sm:$0xff] (!%p139_p2) }
   0x7   : > { %v975_v5 = vpack.c.bf16 (!%p139_p2), %v181_v4, %v180_v2  ;;  %v979_v8 = vpack.c.bf16 (!%p139_p2), %v183_v7, %v182_v6  ;;  %v184_v9 = vld [vmem:[%s1272_s1 + $0x30] sm:$0xff] (!%p139_p2)  ;;  %v185_v10 = vld [vmem:[%s1272_s1 + $0x38] sm:$0xff] (!%p139_p2)  ;;  %v783_v16 = vld [vmem:[%s1272_s1 + $0x40] sm:$0xff] (!%p139_p2) }
   0x8   : > { %972 = vmatprep.subr.bf16.mxu0 (!%p139_p2), %v971_v3  ;;  %v983_v12 = vpack.c.bf16 (!%p139_p2), %v185_v10, %v184_v9  ;;  %v784_v17 = vld [vmem:[%s1272_s1 + $0x48] sm:$0xff] (!%p139_p2)  ;;  %v785_v19 = vld [vmem:[%s1272_s1 + $0x50] sm:$0xff] (!%p139_p2)  ;;  %v786_v20 = vld [vmem:[%s1272_s1 + $0x58] sm:$0xff] (!%p139_p2) }
   0x9   : > { %974 = vmatpush3.bf16.msra.mxu0 (!%p139_p2), %v971_v3  ;;  %v987_v18 = vpack.c.bf16 (!%p139_p2), %v784_v17, %v783_v16  ;;  %v991_v21 = vpack.c.bf16 (!%p139_p2), %v786_v20, %v785_v19  ;;  %v787_v22 = vld [vmem:[%s1272_s1 + $0x60] sm:$0xff] (!%p139_p2)  ;;  %v788_v23 = vld [vmem:[%s1272_s1 + $0x68] sm:$0xff] (!%p139_p2)  ;;  %v789_v25 = vld [vmem:[%s1272_s1 + $0x70] sm:$0xff] (!%p139_p2) }
   0xa   : > { %976 = vmatprep.subr.bf16.mxu0 (!%p139_p2), %v975_v5  ;;  %v995_v24 = vpack.c.bf16 (!%p139_p2), %v788_v23, %v787_v22  ;;  %v790_v26 = vld [vmem:[%s1272_s1 + $0x78] sm:$0xff] (!%p139_p2)  ;;  %v774_v28 = vld [vmem:[%s1273_s2] ss:$0 sm:$0xff] (!%p139_p2)  ;;  %v802_v54 = vld [vmem:[%s1272_s1 + $0x88] sm:$0xff] (!%p139_p2) }
   0xb   : > { %988 = vmatprep.subr.bf16.mxu1 (!%p139_p2), %v987_v18  ;;  %v999_v27 = vpack.c.bf16 (!%p139_p2), %v790_v26, %v789_v25  ;;  %v801_v53 = vld [vmem:[%s1272_s1 + $0x80] sm:$0xff] (!%p139_p2)  ;;  %v803_v56 = vld [vmem:[%s1272_s1 + $0x90] sm:$0xff] (!%p139_p2)  ;;  %v804_v57 = vld [vmem:[%s1272_s1 + $0x98] sm:$0xff] (!%p139_p2) }
   0xc   : > { %990 = vmatpush3.bf16.msra.mxu1 (!%p139_p2), %v987_v18  ;;  %v1003_v55 = vpack.c.bf16 (!%p139_p2), %v802_v54, %v801_v53  ;;  %v1007_v58 = vpack.c.bf16 (!%p139_p2), %v804_v57, %v803_v56  ;;  %v805_v59 = vld [vmem:[%s1272_s1 + $0xa0] sm:$0xff] (!%p139_p2)  ;;  %v806_v60 = vld [vmem:[%s1272_s1 + $0xa8] sm:$0xff] (!%p139_p2)  ;;  %v807_v62 = vld [vmem:[%s1272_s1 + $0xb0] sm:$0xff] (!%p139_p2) }
   0xd   : > { %s1276_s20 = smov (!%p163_p3, %s770_s20), 15  ;;  %978 = vmatpush3.bf16.msra.mxu0 %v975_v5  ;;  %992 = vmatprep.subr.bf16.mxu1 %v991_v21  ;;  %v1011_v61 = vpack.c.bf16 %v806_v60, %v805_v59  ;;  %v808_v63 = vld [vmem:[%s1272_s1 + $0xb8] sm:$0xff]  ;;  %v792_v1 = vld [vmem:[%s1273_s2 + $0x1] ss:$0 sm:$0xff] }
   0xe   : > { %s771_s27 = sshll.u32 %s1276_s20, 3  ;;  %980 = vmatprep.subr.bf16.mxu0 %v979_v8  ;;  %v1015_v0 = vpack.c.bf16 %v808_v63, %v807_v62  ;;  %v819_v26 = vld [vmem:[%s1272_s1 + $0xc0] sm:$0xff] }
   0xf   : > { %s166_s7 = scalar_lea.vmem %s1271_s0, %s771_s27  ;;  %v828_v63 = vld [vmem:[%s1273_s2 + $0x3] ss:$0 sm:$0xff]  ;;  %s172_s19 = scalar_lea.vmem %s1274_s3, %s771_s27 }
  0x10   : > { %v174_v11 = vld [vmem:[%s166_s7] sm:$0xff]  ;;  %v175_v13 = vld [vmem:[%s166_s7 + $0x8] sm:$0xff]  ;;  %v176_v14 = vld [vmem:[%s166_s7 + $0x10] sm:$0xff]  ;;  %994 = vmatpush3.bf16.msra.mxu1 %v991_v21 }
  0x11   : > { %899 = vmatprep.mubr.msk.f32.mxu0 %vm193_vm0, %v174_v11  ;;  %982 = vmatpush3.bf16.msra.mxu0 %v979_v8  ;;  %v177_v15 = vld [vmem:[%s166_s7 + $0x18] sm:$0xff] }
  0x12   : > { %984 = vmatprep.subr.bf16.mxu0 %v983_v12  ;;  %996 = vmatprep.subr.bf16.mxu1 %v995_v24 }
  0x14   : > { %998 = vmatpush3.bf16.msra.mxu1 %v995_v24 }
  0x15   : > { %986 = vmatpush3.bf16.msra.mxu0 %v983_v12  ;;  %1000 = vmatprep.subr.bf16.mxu1 %v999_v27 }
  0x16   : > { %1004 = vmatprep.subr.bf16.mxu0 %v1003_v55 }
  0x18   : > { %900 = vmatmul.mubr.msk.f32.vlgmr.msra.gmra.mrb[0].mxu0 %vm193_vm0, %v175_v13  ;;  %1002 = vmatpush3.bf16.msra.mxu1 %v999_v27  ;;  %v820_v27 = vld [vmem:[%s1272_s1 + $0xc8] sm:$0xff] }
  0x19   : > { %902 = vmatprep.mubr.msk.f32.mxu0 %vm193_vm0, %v176_v14  ;;  %1006 = vmatpush3.bf16.msra.mxu0 %v1003_v55 }
  0x1a   : > { %1008 = vmatprep.subr.bf16.mxu0 %v1007_v58 }
  0x1c   : > { %903 = vmatmul.mubr.msk.f32.gmra.mrb[2].mxu0 %vm193_vm0, %v177_v15 }
  0x1d   : > { %1010 = vmatpush3.bf16.msra.mxu0 %v1007_v58 }
  0x1e   : > { %1012 = vmatprep.subr.bf16.mxu0 %v1011_v61 }
  0x21   : > { %1014 = vmatpush3.bf16.msra.mxu0 %v1011_v61 }
  0x22   : > { %1016 = vmatprep.subr.bf16.mxu0 %v1015_v0 }
  0x25   : > { %1018 = vmatpush3.bf16.msra.mxu0 %v1015_v0 }
  0xeb   : > { %v901_v29 = vpop.f32.mrb[0].mxu0 }
  0xec   : > { %v278_v30 = vadd.f32 %v901_v29, %v774_v28  ;;  %v272_v31 = vpop.f32.mrb[1].mxu0  ;;  %v821_v29 = vld [vmem:[%s1272_s1 + $0xd0] sm:$0xff] }
  0xed   : > { %v273_v32 = vadd.f32 %v774_v28, %v272_v31 }
  0xee   : > { %v780_v33 = vmul.f32 -1.442695, %v278_v30  ;;  %v822_v30 = vld [vmem:[%s1272_s1 + $0xd8] sm:$0xff] }
  0xef   : > { %v779_v34 = vmul.f32 -1.442695, %v273_v32  ;;  %v904_v35 = vpop.f32.mrb[2].mxu0  ;;  %v1023_v31 = vpack.c.bf16 %v822_v30, %v821_v29  ;;  %v823_v32 = vld [vmem:[%s1272_s1 + $0xe0] sm:$0xff] }
  0xf0   : > { %1043 = vpow2.f32 %v780_v33  ;;  %v288_v36 = vadd.f32 %v904_v35, %v774_v28  ;;  %v282_v37 = vpop.f32.mrb[3].mxu0  ;;  %v824_v33 = vld [vmem:[%s1272_s1 + $0xe8] sm:$0xff]  ;;  %v825_v35 = vld [vmem:[%s1272_s1 + $0xf0] sm:$0xff] }
  0xf1   : > { %1045 = vpow2.f32 %v779_v34  ;;  %v283_v38 = vadd.f32 %v774_v28, %v282_v37  ;;  %v1019_v28 = vpack.c.bf16 %v820_v27, %v819_v26  ;;  %v1027_v34 = vpack.c.bf16 %v824_v33, %v823_v32 }
  0xf2   : > { %v782_v39 = vmul.f32 -1.442695, %v288_v36  ;;  %v826_v36 = vld [vmem:[%s1272_s1 + $0xf8] sm:$0xff] }
  0xf3   : > { %v781_v40 = vmul.f32 -1.442695, %v283_v38  ;;  %1020 = vmatprep.subr.bf16.mxu1 %v1019_v28  ;;  %v1031_v37 = vpack.c.bf16 %v826_v36, %v825_v35  ;;  %v810_v38 = vld [vmem:[%s1273_s2 + $0x2] ss:$0 sm:$0xff] }
  0xf4   : > { %1047 = vpow2.f32 %v782_v39 }
  0xf5   : > { %1049 = vpow2.f32 %v781_v40 }
  0xfa   : > { %v1044_v41 = vpop.eup %1043 }
  0xfb   : > { %v1046_v42 = vpop.eup %1045  ;;  %v304_v43 = vadd.f32 1.0, %v1044_v41 }
  0xfc   : > { %v303_v44 = vadd.f32 1.0, %v1046_v42 }
  0xfe   : > { %v1048_v45 = vpop.eup %1047  ;;  %1051 = vrcp.f32 %v303_v44 }
  0xff   : > { %v1050_v46 = vpop.eup %1049  ;;  %1053 = vrcp.f32 %v304_v43  ;;  %v306_v47 = vadd.f32 1.0, %v1048_v45 }
 0x100   : > { %v305_v48 = vadd.f32 1.0, %v1050_v46 }
 0x102   : > { %1055 = vrcp.f32 %v305_v48 }
 0x103   : > { %1057 = vrcp.f32 %v306_v47 }
 0x108   : > { %v1052_v49 = vpop.eup %1051 }
 0x109   : > { %v1054_v50 = vpop.eup %1053  ;;  %921 = vmatprep.mubr.msk.f32.mxu1 %vm193_vm0, %v1052_v49 }
 0x10a   : > { %922 = vmatmul.mubr.msk.f32.vlgmr.msra.gmra.mrb[0].mxu1 %vm193_vm0, %v1054_v50 }
 0x10b   : > { %1022 = vmatpush3.bf16.msra.mxu1 %v1019_v28 }
 0x10c   : > { %v1056_v51 = vpop.eup %1055  ;;  %1024 = vmatprep.subr.bf16.mxu1 %v1023_v31 }
 0x10d   : > { %v1058_v52 = vpop.eup %1057  ;;  %924 = vmatprep.mubr.msk.f32.mxu1 %vm193_vm0, %v1056_v51 }
 0x10e   : > { %925 = vmatmul.mubr.msk.f32.gmra.mrb[2].mxu1 %vm193_vm0, %v1058_v52 }
 0x10f   : > { %1026 = vmatpush3.bf16.msra.mxu1 %v1023_v31 }
 0x110   : > { %1028 = vmatprep.subr.bf16.mxu1 %v1027_v34 }
 0x113   : > { %1030 = vmatpush3.bf16.msra.mxu1 %v1027_v34 }
 0x114   : > { %1032 = vmatprep.subr.bf16.mxu1 %v1031_v37 }
 0x117   : > { %1034 = vmatpush3.bf16.msra.mxu1 %v1031_v37 }
 0x1dd   : > { %v923_v2 = vpop.f32.mrb[0].mxu1 }
 0x1de   : > { %v416_v3 = vadd.f32 %v923_v2, %v792_v1  ;;  %v410_v4 = vpop.f32.mrb[1].mxu1 }
 0x1df   : > { %v411_v5 = vadd.f32 %v792_v1, %v410_v4 }
 0x1e0   : > { %v798_v6 = vmul.f32 -1.442695, %v416_v3 }
 0x1e1   : > { %v797_v7 = vmul.f32 -1.442695, %v411_v5  ;;  %v926_v8 = vpop.f32.mrb[2].mxu1 }
 0x1e2   : > { %1059 = vpow2.f32 %v798_v6  ;;  %v426_v9 = vadd.f32 %v926_v8, %v792_v1  ;;  %v420_v10 = vpop.f32.mrb[3].mxu1 }
 0x1e3   : > { %1061 = vpow2.f32 %v797_v7  ;;  %v421_v11 = vadd.f32 %v792_v1, %v420_v10 }
 0x1e4   : > { %v800_v12 = vmul.f32 -1.442695, %v426_v9 }
 0x1e5   : > { %v799_v13 = vmul.f32 -1.442695, %v421_v11 }
 0x1e6   : > { %1063 = vpow2.f32 %v800_v12 }
 0x1e7   : > { %1065 = vpow2.f32 %v799_v13 }
 0x1ec   : > { %v1060_v14 = vpop.eup %1059 }
 0x1ed   : > { %v1062_v15 = vpop.eup %1061  ;;  %v442_v16 = vadd.f32 1.0, %v1060_v14 }
 0x1ee   : > { %v441_v17 = vadd.f32 1.0, %v1062_v15 }
 0x1f0   : > { %v1064_v18 = vpop.eup %1063  ;;  %1067 = vrcp.f32 %v441_v17 }
 0x1f1   : > { %v1066_v19 = vpop.eup %1065  ;;  %1069 = vrcp.f32 %v442_v16  ;;  %v444_v20 = vadd.f32 1.0, %v1064_v18 }
 0x1f2   : > { %v443_v21 = vadd.f32 1.0, %v1066_v19 }
 0x1f4   : > { %1071 = vrcp.f32 %v443_v21 }
 0x1f5   : > { %1073 = vrcp.f32 %v444_v20 }
 0x1fa   : > { %v1068_v22 = vpop.eup %1067 }
 0x1fb   : > { %v1070_v23 = vpop.eup %1069  ;;  %943 = vmatprep.mubr.msk.f32.mxu0 %vm193_vm0, %v1068_v22 }
 0x1fc   : > { %944 = vmatmul.mubr.msk.f32.vlgmr.msra.gmra.mrb[4].mxu0 %vm193_vm0, %v1070_v23 }
 0x1fe   : > { %v1072_v24 = vpop.eup %1071 }
 0x1ff   : > { %v1074_v25 = vpop.eup %1073  ;;  %946 = vmatprep.mubr.msk.f32.mxu0 %vm193_vm0, %v1072_v24 }
 0x200   : > { %947 = vmatmul.mubr.msk.f32.gmra.mrb[6].mxu0 %vm193_vm0, %v1074_v25 }
 0x2cf   : > { %v945_v39 = vpop.f32.mrb[4].mxu0 }
 0x2d0   : > { %v554_v40 = vadd.f32 %v945_v39, %v810_v38  ;;  %v548_v41 = vpop.f32.mrb[5].mxu0 }
 0x2d1   : > { %v549_v42 = vadd.f32 %v810_v38, %v548_v41 }
 0x2d2   : > { %v816_v43 = vmul.f32 -1.442695, %v554_v40 }
 0x2d3   : > { %v815_v44 = vmul.f32 -1.442695, %v549_v42  ;;  %v948_v45 = vpop.f32.mrb[6].mxu0 }
 0x2d4   : > { %1075 = vpow2.f32 %v816_v43  ;;  %v564_v46 = vadd.f32 %v948_v45, %v810_v38  ;;  %v558_v47 = vpop.f32.mrb[7].mxu0 }
 0x2d5   : > { %1077 = vpow2.f32 %v815_v44  ;;  %v559_v48 = vadd.f32 %v810_v38, %v558_v47 }
 0x2d6   : > { %v818_v49 = vmul.f32 -1.442695, %v564_v46 }
 0x2d7   : > { %v817_v50 = vmul.f32 -1.442695, %v559_v48 }
 0x2d8   : > { %1079 = vpow2.f32 %v818_v49 }
 0x2d9   : > { %1081 = vpow2.f32 %v817_v50 }
 0x2de   : > { %v1076_v51 = vpop.eup %1075 }
 0x2df   : > { %v1078_v52 = vpop.eup %1077  ;;  %v580_v53 = vadd.f32 1.0, %v1076_v51 }
 0x2e0   : > { %v579_v54 = vadd.f32 1.0, %v1078_v52 }
 0x2e2   : > { %v1080_v55 = vpop.eup %1079  ;;  %1083 = vrcp.f32 %v579_v54 }
 0x2e3   : > { %v1082_v56 = vpop.eup %1081  ;;  %1085 = vrcp.f32 %v580_v53  ;;  %v582_v57 = vadd.f32 1.0, %v1080_v55 }
 0x2e4   : > { %v581_v58 = vadd.f32 1.0, %v1082_v56 }
 0x2e6   : > { %1087 = vrcp.f32 %v581_v58 }
 0x2e7   : > { %1089 = vrcp.f32 %v582_v57 }
 0x2ec   : > { %v1084_v59 = vpop.eup %1083 }
 0x2ed   : > { %v1086_v60 = vpop.eup %1085  ;;  %965 = vmatprep.mubr.msk.f32.mxu1 %vm193_vm0, %v1084_v59 }
 0x2ee   : > { %966 = vmatmul.mubr.msk.f32.vlgmr.msra.gmra.mrb[4].mxu1 %vm193_vm0, %v1086_v60 }
 0x2f0   : > { %v1088_v61 = vpop.eup %1087 }
 0x2f1   : > { %v1090_v62 = vpop.eup %1089  ;;  %968 = vmatprep.mubr.msk.f32.mxu1 %vm193_vm0, %v1088_v61 }
 0x2f2   : > { %969 = vmatmul.mubr.msk.f32.gmra.mrb[6].mxu1 %vm193_vm0, %v1090_v62 }
 0x3c1   : > { %v967_v0 = vpop.f32.mrb[4].mxu1 }
 0x3c2   : > { %v692_v1 = vadd.f32 %v967_v0, %v828_v63  ;;  %v686_v2 = vpop.f32.mrb[5].mxu1 }
 0x3c3   : > { %v687_v3 = vadd.f32 %v828_v63, %v686_v2 }
 0x3c4   : > { %706 = vst.msk [vmem:[%s172_s19 + $0x8] sm:$0xff] %vm193_vm0, %v692_v1 }
 0x3c5   : > { %705 = vst.msk [vmem:[%s172_s19] sm:$0xff] %vm193_vm0, %v687_v3  ;;  %v970_v4 = vpop.f32.mrb[6].mxu1 }
 0x3c6   : > { %v702_v5 = vadd.f32 %v970_v4, %v828_v63  ;;  %v696_v6 = vpop.f32.mrb[7].mxu1 }
 0x3c7   : > { %v697_v7 = vadd.f32 %v828_v63, %v696_v6 }
 0x3c8   : > { %708 = vst.msk [vmem:[%s172_s19 + $0x18] sm:$0xff] %vm193_vm0, %v702_v5 }
 0x3c9   : > { %707 = vst.msk [vmem:[%s172_s19 + $0x10] sm:$0xff] %vm193_vm0, %v697_v7 }
 0x3ca PF: > { %s13_s12 = sadd.s32 1, %s1097_s12  }
 0x3cb   : > { %p10_p4 = scmp.ge.s32.totalorder %s13_s12, 6  }
 0x3cd   :  { %12 = sbr.rel (!%p10_p4) target bundleno = 1 (0x1), region = 68 }

</bundles_post_ra>
